<compile_context>
chip_gen: v7x
topology: tpu7x:2x2x1
jax: 0.10.0
libtpu: 0.0.40
codegen_flags: <defaults>
</compile_context>

<pallas_src>
import math

import jax
import jax.numpy as jnp
from jax.experimental import pallas as pl
from jax.experimental.pallas import tpu as pltpu

_CHUNK = 2048             # lane sub-chunk processed per inner-loop iteration
_DEFAULT_TB = 131072      # requested streamed lanes per grid step (~2 MiB in+out)
_SPLIT_THRESHOLD = 65536  # batch (in lanes) above which we force >= 2 grid steps


def _round_up(x, m):
    return ((x + m - 1) // m) * m


def actionfc_kernel(x_ref, w1_ref, b1_ref, w2_ref, b2_ref, w3_ref, b3_ref, o_ref):
    tb = x_ref.shape[1]
    nchunks = tb // _CHUNK  # static Python int

    # Weights / biases are VMEM-resident (constant index_maps). Load them once
    # per grid step, outside the chunk loop (no per-chunk re-materialization).
    w1c0 = w1_ref[:, 0:1]          # (16, 1)
    w1c1 = w1_ref[:, 1:2]          # (16, 1)
    b1 = b1_ref[...]               # (16, 1)
    w2 = w2_ref[...]               # (32, 16)
    b2 = b2_ref[...]               # (32, 1)
    w3 = w3_ref[...]               # (2, 32)
    b3 = b3_ref[...]               # (2, 1)

    @pl.loop(0, nchunks)
    def _(j):
        s = pl.multiple_of(j * _CHUNK, _CHUNK)
        xs = x_ref[:, pl.ds(s, _CHUNK)]                  # (2, CH) lane-dense

        # Layer 1: K=2 -> two VPU broadcast-FMAs (MXU push would be ~empty).
        h1 = w1c0 * xs[0:1, :] + w1c1 * xs[1:2, :]       # (16, CH)
        h1 = jnp.maximum(h1 + b1, 0.0)                   # ReLU

        # Layer 2: (32,16) @ (16,CH) on the MXU, f32 accumulation.
        h2 = jnp.dot(w2, h1, preferred_element_type=jnp.float32)   # (32, CH)
        h2 = jnp.maximum(h2 + b2, 0.0)                   # ReLU

        # Layer 3: (2,32) @ (32,CH); lane-dense output store.
        out = jnp.dot(w3, h2, preferred_element_type=jnp.float32)  # (2, CH)
        o_ref[:, pl.ds(s, _CHUNK)] = (out + b3).astype(o_ref.dtype)


def _choose_tb(batch, tb_req):
    total = _round_up(batch, _CHUNK)
    tb = max(_CHUNK, min(_round_up(tb_req, _CHUNK), total))
    if total >= _SPLIT_THRESHOLD:
        # Guarantee >= 2 grid steps so both v7x TensorCores get work, while
        # each step still streams >= ~0.5 MiB.
        tb = min(tb, _round_up(-(-total // 2), _CHUNK))
    return tb


def agmodel_forward_t(action_t, params, tb=_DEFAULT_TB):
    """Pallas actionfc on a feature-major (2, B) action stream -> (2, B)."""
    w1, b1, w2, b2, w3, b3 = params
    B = action_t.shape[1]
    tb = _choose_tb(B, tb)
    grid = (pl.cdiv(B, tb),)

    def resident(shape):
        # Constant index_map -> loaded once, stays VMEM-resident across steps.
        return pl.BlockSpec(shape, lambda i: (0, 0))

    param_bytes = sum(int(p.size) * 4 for p in params)
    cost = pl.CostEstimate(
        flops=2 * B * (2 * 16 + 16 * 32 + 32 * 2),
        transcendentals=0,
        bytes_accessed=B * 2 * 4 * 2 + param_bytes,      # kernel-only traffic
    )

    return pl.pallas_call(
        actionfc_kernel,
        grid=grid,
        in_specs=[
            pl.BlockSpec((2, tb), lambda i: (0, i)),     # streamed action tile
            resident(w1.shape), resident(b1.shape),
            resident(w2.shape), resident(b2.shape),
            resident(w3.shape), resident(b3.shape),
        ],
        out_specs=pl.BlockSpec((2, tb), lambda i: (0, i)),
        out_shape=jax.ShapeDtypeStruct((2, B), jnp.float32),
        compiler_params=pltpu.CompilerParams(
            dimension_semantics=("parallel",),           # megacore shard on v7x
            vmem_limit_bytes=32 * 1024 * 1024,           # ~5 MiB actually used
        ),
        cost_estimate=cost,
    )(action_t, w1, b1, w2, b2, w3, b3)


def agmodel_forward(action, params, tb=_DEFAULT_TB, min_pallas_batch=16384):
    """AGmodel.forward (== forward1 / self.actionfc) on a (B, 2) action batch."""
    B = action.shape[0]
    if B < min_pallas_batch:
        # Small batches: two layout transposes + pallas launch/step overhead
        # cost more than a fused XLA path; the kernel pays off on big streams.
        return reference_forward(action, params)
    # Layout plumbing only (batch -> lane axis). Callers that can natively
    # produce/consume (2, B) should call agmodel_forward_t and skip this.
    out_t = agmodel_forward_t(jnp.transpose(action), params, tb=tb)
    return jnp.transpose(out_t)


def init_actionfc_params(key):
    """Deterministic init matching nn.Linear default (uniform +-1/sqrt(fan_in)).

    Weights use PyTorch convention (out_features, in_features); biases are
    (out_features, 1) so they broadcast over the lane (batch) axis.
    """
    dims = [(2, 16), (16, 32), (32, 2)]
    params = []
    for (fan_in, fan_out) in dims:
        key, kw, kb = jax.random.split(key, 3)
        bound = 1.0 / math.sqrt(fan_in)
        w = jax.random.uniform(kw, (fan_out, fan_in), jnp.float32, -bound, bound)
        b = jax.random.uniform(kb, (fan_out, 1), jnp.float32, -bound, bound)
        params.extend([w, b])
    return tuple(params)


def reference_forward(action, params):
    """Plain-JAX reference of the same MLP (PyTorch x @ W.T + b)."""
    w1, b1, w2, b2, w3, b3 = params
    h1 = jnp.maximum(action @ w1.T + b1.T, 0.0)
    h2 = jnp.maximum(h1 @ w2.T + b2.T, 0.0)
    return h2 @ w3.T + b3.T


if __name__ == "__main__":
    root = jax.random.PRNGKey(0)
    kp, k1, k2, k3 = jax.random.split(root, 4)
    params = init_actionfc_params(kp)

    cases = [
        # (action, kwargs): exercise single ragged block, multi-chunk block,
        # and multi-block grid with a ragged tail.
        (jax.random.normal(k1, (8, 2), jnp.float32), {}),
        (jax.random.normal(k2, (2500, 2), jnp.float32), dict(tb=4096)),
        (jax.random.normal(k3, (5000, 2), jnp.float32), dict(tb=2048)),
    ]
    for action, kw in cases:
        out = jax.block_until_ready(
            agmodel_forward(action, params, min_pallas_batch=0, **kw))
        ref = reference_forward(action, params)
        assert out.shape == action.shape
        # Tolerance covers MXU f32 multi-pass rounding differences between the
        # Pallas and XLA paths.
        assert jnp.allclose(out, ref, atol=1e-3, rtol=1e-3), (
            float(jnp.max(jnp.abs(out - ref))))

    print("KERNEL_OK")
</pallas_src>

<mosaic_0001>
module attributes {stable_mosaic.version = 11 : i64} {
  func.func @actionfc_kernel(%arg0: i32, %arg1: memref<2x2048xf32, #tpu.memory_space<vmem>>, %arg2: memref<16x2xf32, #tpu.memory_space<vmem>>, %arg3: memref<16x1xf32, #tpu.memory_space<vmem>>, %arg4: memref<32x16xf32, #tpu.memory_space<vmem>>, %arg5: memref<32x1xf32, #tpu.memory_space<vmem>>, %arg6: memref<2x32xf32, #tpu.memory_space<vmem>>, %arg7: memref<2x1xf32, #tpu.memory_space<vmem>>, %arg8: memref<2x2048xf32, #tpu.memory_space<vmem>>) attributes {dimension_semantics = [#tpu.dimension_semantics<parallel>], iteration_bounds = array<i64: 1>, scalar_prefetch = 0 : i64, scratch_operands = 0 : i64, tpu.core_type = #tpu.core_type<tc>, window_params = [{transform_indices = @transform_0, window_bounds = array<i64: 2, 2048>}, {pipeline_mode = #tpu.pipeline_mode<synchronous>, transform_indices = @transform_1, window_bounds = array<i64: 16, 2>}, {pipeline_mode = #tpu.pipeline_mode<synchronous>, transform_indices = @transform_2, window_bounds = array<i64: 16, 1>}, {pipeline_mode = #tpu.pipeline_mode<synchronous>, transform_indices = @transform_3, window_bounds = array<i64: 32, 16>}, {pipeline_mode = #tpu.pipeline_mode<synchronous>, transform_indices = @transform_4, window_bounds = array<i64: 32, 1>}, {pipeline_mode = #tpu.pipeline_mode<synchronous>, transform_indices = @transform_5, window_bounds = array<i64: 2, 32>}, {pipeline_mode = #tpu.pipeline_mode<synchronous>, transform_indices = @transform_6, window_bounds = array<i64: 2, 1>}, {transform_indices = @transform_7, window_bounds = array<i64: 2, 2048>}]} {
    %c0 = arith.constant 0 : index
    %c0_0 = arith.constant 0 : index
    %0 = vector.load %arg2[%c0, %c0_0] : memref<16x2xf32, #tpu.memory_space<vmem>>, vector<16x1xf32>
    %c0_1 = arith.constant 0 : index
    %c1 = arith.constant 1 : index
    %1 = vector.load %arg2[%c0_1, %c1] : memref<16x2xf32, #tpu.memory_space<vmem>>, vector<16x1xf32>
    %c0_2 = arith.constant 0 : index
    %c0_3 = arith.constant 0 : index
    %2 = vector.load %arg3[%c0_2, %c0_3] : memref<16x1xf32, #tpu.memory_space<vmem>>, vector<16x1xf32>
    %c0_4 = arith.constant 0 : index
    %c0_5 = arith.constant 0 : index
    %3 = vector.load %arg4[%c0_4, %c0_5] : memref<32x16xf32, #tpu.memory_space<vmem>>, vector<32x16xf32>
    %c0_6 = arith.constant 0 : index
    %c0_7 = arith.constant 0 : index
    %4 = vector.load %arg5[%c0_6, %c0_7] : memref<32x1xf32, #tpu.memory_space<vmem>>, vector<32x1xf32>
    %c0_8 = arith.constant 0 : index
    %c0_9 = arith.constant 0 : index
    %5 = vector.load %arg6[%c0_8, %c0_9] : memref<2x32xf32, #tpu.memory_space<vmem>>, vector<2x32xf32>
    %c0_10 = arith.constant 0 : index
    %c0_11 = arith.constant 0 : index
    %6 = vector.load %arg7[%c0_10, %c0_11] : memref<2x1xf32, #tpu.memory_space<vmem>>, vector<2x1xf32>
    %c0_i32 = arith.constant 0 : i32
    %c1_i32 = arith.constant 1 : i32
    %7 = arith.muli %c0_i32, %c1_i32 : i32
    %c0_i32_12 = arith.constant 0 : i32
    %8 = arith.addi %c0_i32_12, %7 : i32
    %c2048_i32 = arith.constant 2048 : i32
    %9 = arith.muli %8, %c2048_i32 : i32
    %10 = tpu.assume_multiple %9, 2048 : i32
    %c0_13 = arith.constant 0 : index
    %11 = arith.index_cast %10 : i32 to index
    %12 = vector.load %arg1[%c0_13, %11] : memref<2x2048xf32, #tpu.memory_space<vmem>>, vector<2x2048xf32>
    %13 = vector.extract_strided_slice %12 {offsets = [0, 0], sizes = [1, 2048], strides = [1, 1]} : vector<2x2048xf32> to vector<1x2048xf32>
    %14 = vector.broadcast %0 : vector<16x1xf32> to vector<16x2048xf32>
    %15 = vector.broadcast %13 : vector<1x2048xf32> to vector<16x2048xf32>
    %16 = arith.mulf %14, %15 : vector<16x2048xf32>
    %17 = vector.extract_strided_slice %12 {offsets = [1, 0], sizes = [1, 2048], strides = [1, 1]} : vector<2x2048xf32> to vector<1x2048xf32>
    %18 = vector.broadcast %1 : vector<16x1xf32> to vector<16x2048xf32>
    %19 = vector.broadcast %17 : vector<1x2048xf32> to vector<16x2048xf32>
    %20 = arith.mulf %18, %19 : vector<16x2048xf32>
    %21 = arith.addf %16, %20 : vector<16x2048xf32>
    %22 = vector.broadcast %2 : vector<16x1xf32> to vector<16x2048xf32>
    %23 = arith.addf %21, %22 : vector<16x2048xf32>
    %cst = arith.constant 0.000000e+00 : f32
    %24 = vector.broadcast %cst : f32 to vector<16x2048xf32>
    %25 = arith.maximumf %23, %24 : vector<16x2048xf32>
    %cst_14 = arith.constant dense<0.000000e+00> : vector<32x2048xf32>
    %26 = tpu.matmul %3, %25, %cst_14 {dimension_numbers = #tpu.dot_dimension_numbers<[1], [0], [0], [1], [0, 0, 1, 1], [], []>} : vector<32x16xf32>, vector<16x2048xf32>, vector<32x2048xf32> -> vector<32x2048xf32>
    %27 = vector.broadcast %4 : vector<32x1xf32> to vector<32x2048xf32>
    %28 = arith.addf %26, %27 : vector<32x2048xf32>
    %cst_15 = arith.constant 0.000000e+00 : f32
    %29 = vector.broadcast %cst_15 : f32 to vector<32x2048xf32>
    %30 = arith.maximumf %28, %29 : vector<32x2048xf32>
    %cst_16 = arith.constant dense<0.000000e+00> : vector<2x2048xf32>
    %31 = tpu.matmul %5, %30, %cst_16 {dimension_numbers = #tpu.dot_dimension_numbers<[1], [0], [0], [1], [0, 0, 1, 1], [], []>} : vector<2x32xf32>, vector<32x2048xf32>, vector<2x2048xf32> -> vector<2x2048xf32>
    %32 = vector.broadcast %6 : vector<2x1xf32> to vector<2x2048xf32>
    %33 = arith.addf %31, %32 : vector<2x2048xf32>
    %c0_17 = arith.constant 0 : index
    %34 = arith.index_cast %10 : i32 to index
    %35 = vector.load %arg8[%c0_17, %34] : memref<2x2048xf32, #tpu.memory_space<vmem>>, vector<2x2048xf32>
    tpu.vector_store %arg8[%c0_17, %34], %33 {strides = array<i32>} : memref<2x2048xf32, #tpu.memory_space<vmem>>, vector<2x2048xf32>,
    %c1_i32_18 = arith.constant 1 : i32
    return
  }
  func.func @transform_0(%arg0: i32) -> (i32, i32) {
    %c0_i32 = arith.constant 0 : i32
    %c0_i32_0 = arith.constant 0 : i32
    return %c0_i32, %arg0 : i32, i32
  }
  func.func @transform_1(%arg0: i32) -> (i32, i32) {
    %c0_i32 = arith.constant 0 : i32
    %c0_i32_0 = arith.constant 0 : i32
    %c0_i32_1 = arith.constant 0 : i32
    return %c0_i32, %c0_i32_0 : i32, i32
  }
  func.func @transform_2(%arg0: i32) -> (i32, i32) {
    %c0_i32 = arith.constant 0 : i32
    %c0_i32_0 = arith.constant 0 : i32
    %c0_i32_1 = arith.constant 0 : i32
    return %c0_i32, %c0_i32_0 : i32, i32
  }
  func.func @transform_3(%arg0: i32) -> (i32, i32) {
    %c0_i32 = arith.constant 0 : i32
    %c0_i32_0 = arith.constant 0 : i32
    %c0_i32_1 = arith.constant 0 : i32
    return %c0_i32, %c0_i32_0 : i32, i32
  }
  func.func @transform_4(%arg0: i32) -> (i32, i32) {
    %c0_i32 = arith.constant 0 : i32
    %c0_i32_0 = arith.constant 0 : i32
    %c0_i32_1 = arith.constant 0 : i32
    return %c0_i32, %c0_i32_0 : i32, i32
  }
  func.func @transform_5(%arg0: i32) -> (i32, i32) {
    %c0_i32 = arith.constant 0 : i32
    %c0_i32_0 = arith.constant 0 : i32
    %c0_i32_1 = arith.constant 0 : i32
    return %c0_i32, %c0_i32_0 : i32, i32
  }
  func.func @transform_6(%arg0: i32) -> (i32, i32) {
    %c0_i32 = arith.constant 0 : i32
    %c0_i32_0 = arith.constant 0 : i32
    %c0_i32_1 = arith.constant 0 : i32
    return %c0_i32, %c0_i32_0 : i32, i32
  }
  func.func @transform_7(%arg0: i32) -> (i32, i32) {
    %c0_i32 = arith.constant 0 : i32
    %c0_i32_0 = arith.constant 0 : i32
    return %c0_i32, %arg0 : i32, i32
  }
}

</mosaic_0001>

<bundles_post_ra>
// kernel: tpu_custom_call.1
= control target key start
LH: loop header
LB: loop body
LE: loop exit
PB: predicated region body
PF: predicated region fallthrough
CT: control target
= control target key end

     0   :  { %v2185_v1 = vmov 1   ;;  %v2186_v2 = vmov 0   ;;  %s2825_s0 = inlined_call_operand.vmem [shape: f32[2,8], index: 0, kind: input, shape index: {}]   ;;  %s2826_s1 = inlined_call_operand.vmem [shape: f32[16,2], index: 1, kind: input, shape index: {}]   ;;  %s2827_s2 = inlined_call_operand.vmem [shape: f32[16,1], index: 2, kind: input, shape index: {}]   ;;  %s2828_s3 = inlined_call_operand.vmem [shape: f32[32,16], index: 3, kind: input, shape index: {}]   ;;  %s2829_s4 = inlined_call_operand.vmem [shape: f32[32,1], index: 4, kind: input, shape index: {}]   ;;  %s2830_s5 = inlined_call_operand.vmem [shape: f32[2,32], index: 5, kind: input, shape index: {}]   ;;  %s2831_s6 = inlined_call_operand.vmem [shape: f32[2,1], index: 6, kind: input, shape index: {}]   ;;  %s2832_s7 = inlined_call_operand.hbm [shape: f32[2,8], index: 7, kind: output, shape index: {}]  }
   0x1   :  { %v27_v0 = vld [vmem:[%s2826_s1] sm:$0xff]  ;;  %2159 = vset.pattern.permute.xlu1 %v2185_v1  ;;  %2158 = vset.pattern.permute.xlu0 %v2186_v2  ;;  %v28_v3 = vld [vmem:[%s2826_s1 + $0x8] sm:$0xff] }
   0x2   :  { %236 = vperm.xlu1 %2159, %v27_v0   ;;  %47 = vperm.xlu0 %2158, %v27_v0  }
   0x3   :  { %12 = vsyncpa [#allocation3], 0  ;;  %v29_v4 = vld [vmem:[%s2827_s2] sm:$0xff]  ;;  %v30_v5 = vld [vmem:[%s2827_s2 + $0x8] sm:$0xff]  ;;  %v2187_v11 = vmov 0.0   ;;  %v59_v12 = vlaneseq  ;;  %vm545_vm0 = vcmask 130048  }
   0x4   :  { %v35_v6 = vld [vmem:[%s2829_s4] sm:$0xff]  ;;  %v36_v7 = vld [vmem:[%s2829_s4 + $0x8] sm:$0xff]  ;;  %v37_v8 = vld [vmem:[%s2829_s4 + $0x10] sm:$0xff]  ;;  %622 = vmatprep.mubr.f32.mxu0 %v2187_v11  ;;  %711 = vmatprep.mubr.f32.mxu1 %v2187_v11  ;;  %vm1339_vm1 = vcmask 261120  }
   0x5   :  { %v38_v9 = vld [vmem:[%s2829_s4 + $0x18] sm:$0xff]  ;;  %v40_v10 = vld [vmem:[%s2831_s6] sm:$0x3]  ;;  %v2259_v13 = vshrl.u32 %v59_v12, 7  ;;  %v42_v24 = vld [vmem:[%s2825_s0 + $0x8] sm:$0xff] }
   0x6   :  { %240 = vperm.xlu1 %2159, %v28_v3   ;;  %52 = vperm.xlu0 %2158, %v28_v3   ;;  %v41_v15 = vld [vmem:[%s2825_s0] sm:$0xff]  ;;  %v43_v44 = vld [vmem:[%s2825_s0 + $0x10] sm:$0xff]  ;;  %v44_v57 = vld [vmem:[%s2825_s0 + $0x18] sm:$0xff] }
   0x7   :  { %v2262_v14 = vsub.s32 2, %v2259_v13  ;;  %v2268_v16 = vsub.s32 0, %v2259_v13  ;;  %v2271_v17 = vsub.s32 3, %v2259_v13  ;;  %v2274_v18 = vsub.s32 6, %v2259_v13 }
   0x8   :  { %v2277_v19 = vsub.s32 1, %v2259_v13  ;;  %v2280_v20 = vsub.s32 7, %v2259_v13  ;;  %v2283_v21 = vsub.s32 4, %v2259_v13  ;;  %v2286_v22 = vsub.s32 5, %v2259_v13 }
   0x9   :  { %v66_v23 = vrot.slane %v41_v15, %v2262_v14  ;;  %v250_v25 = vrot.slane %v41_v15, %v2271_v17  ;;  %v74_v26 = vrot.slane %v41_v15, %v2274_v18  ;;  %v62_v27 = vrot.slane %v41_v15, %v2268_v16 }
   0xa   :  { %2160 = vset.pattern.permute.xlu1 %v2186_v2  ;;  %453 = vperm.xlu0 %2158, %v29_v4   ;;  %v258_v28 = vrot.slane %v41_v15, %v2280_v20  ;;  %v246_v29 = vrot.slane %v41_v15, %v2277_v19  ;;  %v70_v30 = vrot.slane %v41_v15, %v2283_v21 }
   0xb   :  { %458 = vperm.xlu1 %2160, %v30_v5   ;;  %v254_v31 = vrot.slane %v41_v15, %v2286_v22  ;;  %v82_v32 = vrot.slane %v42_v24, %v2262_v14  ;;  %v266_v33 = vrot.slane %v42_v24, %v2271_v17  ;;  %v90_v34 = vrot.slane %v42_v24, %v2274_v18 }
   0xc   :  { %v274_v35 = vrot.slane %v42_v24, %v2280_v20  ;;  %v2304_v36 = vrot.slane %v66_v23, %v2268_v16  ;;  %v78_v37 = vrot.slane %v42_v24, %v2268_v16  ;;  %v262_v38 = vrot.slane %v42_v24, %v2277_v19 }
   0xd   :  { %v86_v39 = vrot.slane %v42_v24, %v2283_v21  ;;  %v2310_v40 = vrot.slane %v250_v25, %v2277_v19  ;;  %v2313_v41 = vrot.slane %v74_v26, %v2268_v16  ;;  %v2316_v42 = vrot.slane %v62_v27, %v2268_v16 }
   0xe   :  { %527 = vperm.xlu0 %2158, %v35_v6   ;;  %v270_v43 = vrot.slane %v42_v24, %v2286_v22  ;;  %v2323_v45 = vrot.slane %v258_v28, %v2277_v19  ;;  %v2326_v46 = vrot.slane %v246_v29, %v2277_v19  ;;  %v2329_v47 = vrot.slane %v70_v30, %v2268_v16 }
   0xf   :  { %532 = vperm.xlu1 %2160, %v36_v7   ;;  %v2332_v48 = vrot.slane %v254_v31, %v2277_v19  ;;  %v2335_v49 = vrot.slane %v82_v32, %v2268_v16  ;;  %v2338_v50 = vrot.slane %v266_v33, %v2277_v19  ;;  %v2341_v51 = vrot.slane %v90_v34, %v2268_v16 }
  0x10   :  { %v2344_v52 = vrot.slane %v274_v35, %v2277_v19  ;;  %v2347_v53 = vrot.slane %v78_v37, %v2268_v16  ;;  %v2350_v54 = vrot.slane %v262_v38, %v2277_v19  ;;  %v2353_v55 = vrot.slane %v86_v39, %v2268_v16 }
  0x11   :  { %v98_v56 = vrot.slane %v43_v44, %v2262_v14  ;;  %v2360_v58 = vrot.slane %v270_v43, %v2277_v19  ;;  %v282_v59 = vrot.slane %v43_v44, %v2271_v17  ;;  %v106_v60 = vrot.slane %v43_v44, %v2274_v18 }
  0x12   :  { %537 = vperm.xlu0 %2158, %v37_v8   ;;  %v290_v61 = vrot.slane %v43_v44, %v2280_v20  ;;  %v94_v62 = vrot.slane %v43_v44, %v2268_v16  ;;  %v278_v63 = vrot.slane %v43_v44, %v2277_v19  ;;  %v102_v0 = vrot.slane %v43_v44, %v2283_v21 }
  0x13   :  { %542 = vperm.xlu1 %2160, %v38_v9   ;;  %v286_v1 = vrot.slane %v43_v44, %v2286_v22  ;;  %v114_v2 = vrot.slane %v44_v57, %v2262_v14  ;;  %v298_v3 = vrot.slane %v44_v57, %v2271_v17  ;;  %v122_v4 = vrot.slane %v44_v57, %v2274_v18 }
  0x14   :  { %v306_v5 = vrot.slane %v44_v57, %v2280_v20  ;;  %v110_v6 = vrot.slane %v44_v57, %v2268_v16  ;;  %v294_v7 = vrot.slane %v44_v57, %v2277_v19  ;;  %v118_v8 = vrot.slane %v44_v57, %v2283_v21 }
  0x15   :  { %v302_v9 = vrot.slane %v44_v57, %v2286_v22  ;;  %v2381_v12 = vrot.slane %v282_v59, %v2277_v19  ;;  %v2384_v14 = vrot.slane %v106_v60, %v2268_v16  ;;  %v2387_v15 = vrot.slane %v290_v61, %v2277_v19 }
  0x16   :  { %1336 = vperm.xlu0 %2158, %v40_v10   ;;  %v2378_v10 = vrot.slane %v98_v56, %v2268_v16  ;;  %v2390_v17 = vrot.slane %v94_v62, %v2268_v16  ;;  %v2393_v18 = vrot.slane %v278_v63, %v2277_v19  ;;  %v2396_v20 = vrot.slane %v102_v0, %v2268_v16 }
  0x17   :  { %v2399_v21 = vrot.slane %v286_v1, %v2277_v19  ;;  %v2402_v22 = vrot.slane %v114_v2, %v2268_v16  ;;  %v2405_v23 = vrot.slane %v298_v3, %v2277_v19  ;;  %v2408_v24 = vrot.slane %v122_v4, %v2268_v16 }
  0x18   :  { %v2411_v25 = vrot.slane %v306_v5, %v2277_v19  ;;  %v2418_v28 = vrot.slane %v110_v6, %v2268_v16  ;;  %v2421_v29 = vrot.slane %v294_v7, %v2277_v19  ;;  %v2424_v30 = vrot.slane %v118_v8, %v2268_v16 }
  0x19   :  { %v2427_v31 = vrot.slane %v302_v9, %v2277_v19 }
  0x81   :  { %v2413_v26 = vpop.permute.xlu1 %236  ;;  %v2415_v27 = vpop.permute.xlu0 %47 }
  0x82   :  { %v204_v32 = vmul.f32 %v2304_v36, %v2415_v27  ;;  %v388_v33 = vmul.f32 %v2310_v40, %v2413_v26  ;;  %v206_v34 = vmul.f32 %v2313_v41, %v2415_v27  ;;  %v390_v35 = vmul.f32 %v2323_v45, %v2413_v26 }
  0x83   :  { %v203_v37 = vmul.f32 %v2316_v42, %v2415_v27  ;;  %v387_v16 = vmul.f32 %v2326_v46, %v2413_v26  ;;  %v205_v19 = vmul.f32 %v2329_v47, %v2415_v27  ;;  %v389_v38 = vmul.f32 %v2332_v48, %v2413_v26 }
  0x84   :  { %v420_v39 = vadd.f32 %v388_v33, %v204_v32  ;;  %v422_v43 = vadd.f32 %v390_v35, %v206_v34  ;;  %v208_v44 = vmul.f32 %v2335_v49, %v2415_v27  ;;  %v392_v56 = vmul.f32 %v2338_v50, %v2413_v26 }
  0x85   :  { %v2449_v57 = vpop.permute.xlu1 %240  ;;  %v2451_v59 = vpop.permute.xlu0 %52  ;;  %v419_v60 = vadd.f32 %v387_v16, %v203_v37  ;;  %v421_v61 = vadd.f32 %v389_v38, %v205_v19  ;;  %v210_v62 = vmul.f32 %v2341_v51, %v2415_v27  ;;  %v394_v63 = vmul.f32 %v2344_v52, %v2413_v26 }
  0x86   :  { %v220_v0 = vmul.f32 %v2304_v36, %v2451_v59  ;;  %v404_v1 = vmul.f32 %v2310_v40, %v2449_v57  ;;  %v222_v2 = vmul.f32 %v2313_v41, %v2451_v59  ;;  %v406_v3 = vmul.f32 %v2323_v45, %v2449_v57 }
  0x87   :  { %v219_v4 = vmul.f32 %v2316_v42, %v2451_v59  ;;  %v403_v5 = vmul.f32 %v2326_v46, %v2449_v57  ;;  %v221_v6 = vmul.f32 %v2329_v47, %v2451_v59  ;;  %v405_v36 = vmul.f32 %v2332_v48, %v2449_v57 }
  0x88   :  { %v436_v7 = vadd.f32 %v404_v1, %v220_v0  ;;  %v438_v40 = vadd.f32 %v406_v3, %v222_v2  ;;  %v224_v41 = vmul.f32 %v2335_v49, %v2451_v59  ;;  %v408_v45 = vmul.f32 %v2338_v50, %v2449_v57 }
  0x89   :  { %v2477_v8 = vpop.permute.xlu0 %453  ;;  %v435_v42 = vadd.f32 %v403_v5, %v219_v4  ;;  %v437_v9 = vadd.f32 %v405_v36, %v221_v6  ;;  %v424_v32 = vadd.f32 %v392_v56, %v208_v44  ;;  %v226_v46 = vmul.f32 %v2341_v51, %v2451_v59 }
  0x8a   :  { %v2481_v47 = vpop.permute.xlu1 %458  ;;  %v462_v48 = vadd.f32 %v2477_v8, %v420_v39  ;;  %v464_v33 = vadd.f32 %v2477_v8, %v422_v43  ;;  %v461_v34 = vadd.f32 %v2477_v8, %v419_v60  ;;  %v463_v49 = vadd.f32 %v2477_v8, %v421_v61 }
  0x8b   :  { %v478_v50 = vadd.f32 %v2481_v47, %v436_v7  ;;  %v480_v35 = vadd.f32 %v2481_v47, %v438_v40  ;;  %v477_v37 = vadd.f32 %v2481_v47, %v435_v42  ;;  %v479_v16 = vadd.f32 %v2481_v47, %v437_v9 }
  0x8c   :  { %v494_v19 = vmax.f32 %v462_v48, 0.0  ;;  %v496_v51 = vmax.f32 %v464_v33, 0.0  ;;  %v493_v38 = vmax.f32 %v461_v34, 0.0  ;;  %v495_v44 = vmax.f32 %v463_v49, 0.0 }
  0x8d   :  { %v510_v56 = vmax.f32 %v478_v50, 0.0  ;;  %v512_v39 = vmax.f32 %v480_v35, 0.0  ;;  %v509_v0 = vmax.f32 %v477_v37, 0.0  ;;  %v511_v43 = vmax.f32 %v479_v16, 0.0 }
  0x8e   :  { %v440_v1 = vadd.f32 %v408_v45, %v224_v41  ;;  %v466_v60 = vadd.f32 %v2477_v8, %v424_v32  ;;  %v410_v61 = vmul.f32 %v2344_v52, %v2449_v57  ;;  %v426_v2 = vadd.f32 %v394_v63, %v210_v62  ;;  %v2506_v32 = vld [vmem:[%s2828_s3] sm:$0xff] }
  0x8f   :  { %v2057_v3 = vpack.c.bf16 %v510_v56, %v494_v19  ;;  %v2061_v4 = vpack.c.bf16 %v512_v39, %v496_v51  ;;  %v2059_v5 = vpack.c.bf16 %v509_v0, %v493_v38  ;;  %v2063_v6 = vpack.c.bf16 %v511_v43, %v495_v44  ;;  %v2531_v44 = vld [vmem:[%s2828_s3 + $0x8] sm:$0xff] }
  0x90   :  { %v482_v36 = vadd.f32 %v2481_v47, %v440_v1  ;;  %v498_v7 = vmax.f32 %v466_v60, 0.0  ;;  %v442_v40 = vadd.f32 %v410_v61, %v226_v46  ;;  %v468_v42 = vadd.f32 %v2477_v8, %v426_v2 }
  0x91   :  { %2058 = vmatprep.subr.bf16.mxu0 %v2057_v3  ;;  %2062 = vmatprep.subr.bf16.mxu1 %v2061_v4  ;;  %v207_v41 = vmul.f32 %v2347_v53, %v2415_v27  ;;  %v223_v52 = vmul.f32 %v2347_v53, %v2451_v59  ;;  %v391_v62 = vmul.f32 %v2350_v54, %v2413_v26 }
  0x92   :  { %2060 = vmatpush1.bf16.msra.mxu0 %v2059_v5  ;;  %2064 = vmatpush1.bf16.msra.mxu1 %v2063_v6  ;;  %v514_v63 = vmax.f32 %v482_v36, 0.0  ;;  %v484_v45 = vadd.f32 %v2481_v47, %v442_v40  ;;  %v500_v9 = vmax.f32 %v468_v42, 0.0  ;;  %v407_v46 = vmul.f32 %v2350_v54, %v2449_v57 }
  0x93   :  { %v423_v48 = vadd.f32 %v391_v62, %v207_v41  ;;  %v209_v53 = vmul.f32 %v2353_v55, %v2415_v27  ;;  %v225_v33 = vmul.f32 %v2353_v55, %v2451_v59  ;;  %v393_v34 = vmul.f32 %v2360_v58, %v2413_v26 }
  0x94   :  { %v2065_v49 = vpack.c.bf16 %v514_v63, %v498_v7  ;;  %v516_v50 = vmax.f32 %v484_v45, 0.0  ;;  %v439_v35 = vadd.f32 %v407_v46, %v223_v52  ;;  %v409_v37 = vmul.f32 %v2360_v58, %v2449_v57 }
  0x95   :  { %2017 = vmatmul.mubr.msk.f32.vlgmr.msra.gmra.mrb[0].mxu0 %vm545_vm0, %v2506_v32  ;;  %2021 = vmatmul.mubr.msk.f32.vlgmr.msra.gmra.mrb[0].mxu1 %vm545_vm0, %v2506_v32  ;;  %v465_v54 = vadd.f32 %v2477_v8, %v423_v48  ;;  %v425_v16 = vadd.f32 %v393_v34, %v209_v53  ;;  %v212_v55 = vmul.f32 %v2378_v10, %v2415_v27 }
  0x96   :  { %2066 = vmatprep.subr.bf16.mxu0 %v2065_v49  ;;  %v2069_v19 = vpack.c.bf16 %v516_v50, %v500_v9  ;;  %v481_v51 = vadd.f32 %v2481_v47, %v439_v35  ;;  %v441_v38 = vadd.f32 %v409_v37, %v225_v33  ;;  %v228_v58 = vmul.f32 %v2378_v10, %v2451_v59 }
  0x97   :  { %v497_v56 = vmax.f32 %v465_v54, 0.0  ;;  %v467_v39 = vadd.f32 %v2477_v8, %v425_v16  ;;  %v396_v0 = vmul.f32 %v2381_v12, %v2413_v26  ;;  %v412_v43 = vmul.f32 %v2381_v12, %v2449_v57  ;;  %628 = vmatprep.mubr.f32.mxu0 %v2187_v11  ;;  %717 = vmatprep.mubr.f32.mxu1 %v2187_v11 }
  0x98   :  { %2070 = vmatprep.subr.bf16.mxu1 %v2069_v19  ;;  %v513_v10 = vmax.f32 %v481_v51, 0.0  ;;  %v483_v1 = vadd.f32 %v2481_v47, %v441_v38  ;;  %v214_v60 = vmul.f32 %v2384_v14, %v2415_v27  ;;  %v230_v61 = vmul.f32 %v2384_v14, %v2451_v59  ;;  %v2558_v14 = vld [vmem:[%s2828_s3 + $0x10] sm:$0xff] }
  0x99   :  { %v499_v2 = vmax.f32 %v467_v39, 0.0  ;;  %v428_v3 = vadd.f32 %v396_v0, %v212_v55  ;;  %v444_v4 = vadd.f32 %v412_v43, %v228_v58  ;;  %v398_v12 = vmul.f32 %v2387_v15, %v2413_v26  ;;  %2018 = vmatmul.mubr.msk.f32.gmra.mrb[2].mxu0 %vm545_vm0, %v2531_v44  ;;  %2022 = vmatmul.mubr.msk.f32.gmra.mrb[2].mxu1 %vm545_vm0, %v2531_v44 }
  0x9a   :  { %v2067_v5 = vpack.c.bf16 %v513_v10, %v497_v56  ;;  %v515_v6 = vmax.f32 %v483_v1, 0.0  ;;  %v414_v36 = vmul.f32 %v2387_v15, %v2449_v57  ;;  %634 = vmatprep.mubr.f32.mxu0 %v2187_v11  ;;  %723 = vmatprep.mubr.f32.mxu1 %v2187_v11  ;;  %v211_v7 = vmul.f32 %v2390_v17, %v2415_v27 }
  0x9b   :  { %v470_v40 = vadd.f32 %v2477_v8, %v428_v3  ;;  %v486_v42 = vadd.f32 %v2481_v47, %v444_v4  ;;  %v430_v41 = vadd.f32 %v398_v12, %v214_v60  ;;  %v227_v15 = vmul.f32 %v2390_v17, %v2451_v59 }
  0x9c   :  { %2068 = vmatpush1.bf16.msra.mxu0 %v2067_v5  ;;  %v2071_v52 = vpack.c.bf16 %v515_v6, %v499_v2  ;;  %v446_v62 = vadd.f32 %v414_v36, %v230_v61  ;;  %v395_v63 = vmul.f32 %v2393_v18, %v2413_v26  ;;  %v411_v45 = vmul.f32 %v2393_v18, %v2449_v57  ;;  %v2582_v18 = vld [vmem:[%s2828_s3 + $0x18] sm:$0xff] }
  0x9d   :  { %v502_v9 = vmax.f32 %v470_v40, 0.0  ;;  %v518_v46 = vmax.f32 %v486_v42, 0.0  ;;  %v472_v48 = vadd.f32 %v2477_v8, %v430_v41  ;;  %2019 = vmatmul.mubr.msk.f32.gmra.mrb[4].mxu0 %vm545_vm0, %v2558_v14  ;;  %2023 = vmatmul.mubr.msk.f32.gmra.mrb[4].mxu1 %vm545_vm0, %v2558_v14  ;;  %v213_v17 = vmul.f32 %v2396_v20, %v2415_v27 }
  0x9e   :  { %2072 = vmatpush1.bf16.msra.mxu1 %v2071_v52  ;;  %v488_v53 = vadd.f32 %v2481_v47, %v446_v62  ;;  %640 = vmatprep.mubr.f32.mxu0 %v2187_v11  ;;  %v427_v33 = vadd.f32 %v395_v63, %v211_v7  ;;  %v443_v34 = vadd.f32 %v411_v45, %v227_v15 }
  0x9f   :  { %v2073_v49 = vpack.c.bf16 %v518_v46, %v502_v9  ;;  %v504_v50 = vmax.f32 %v472_v48, 0.0  ;;  %729 = vmatprep.mubr.f32.mxu1 %v2187_v11  ;;  %v229_v35 = vmul.f32 %v2396_v20, %v2451_v59  ;;  %v397_v37 = vmul.f32 %v2399_v21, %v2413_v26 }
  0xa0   :  { %v520_v54 = vmax.f32 %v488_v53, 0.0  ;;  %v469_v16 = vadd.f32 %v2477_v8, %v427_v33  ;;  %v485_v55 = vadd.f32 %v2481_v47, %v443_v34  ;;  %v413_v19 = vmul.f32 %v2399_v21, %v2449_v57 }
  0xa1   :  { %2074 = vmatprep.subr.bf16.mxu0 %v2073_v49  ;;  %2020 = vmatmul.mubr.msk.f32.gmra.mrb[6].mxu0 %vm545_vm0, %v2582_v18  ;;  %v429_v51 = vadd.f32 %v397_v37, %v213_v17  ;;  %v216_v38 = vmul.f32 %v2402_v22, %v2415_v27  ;;  %v232_v20 = vmul.f32 %v2402_v22, %v2451_v59 }
  0xa2   :  { %v2077_v58 = vpack.c.bf16 %v520_v54, %v504_v50  ;;  %2024 = vmatmul.mubr.msk.f32.gmra.mrb[6].mxu1 %vm545_vm0, %v2582_v18  ;;  %800 = vmatprep.mubr.f32.mxu0 %v2187_v11  ;;  %v501_v56 = vmax.f32 %v469_v16, 0.0  ;;  %v517_v39 = vmax.f32 %v485_v55, 0.0  ;;  %v445_v21 = vadd.f32 %v413_v19, %v229_v35  ;;  %v2713_v19 = vpop.permute.xlu0 %527 }
  0xa3   :  { %889 = vmatprep.mubr.f32.mxu1 %v2187_v11  ;;  %v471_v0 = vadd.f32 %v2477_v8, %v429_v51  ;;  %v400_v43 = vmul.f32 %v2405_v23, %v2413_v26  ;;  %v416_v10 = vmul.f32 %v2405_v23, %v2449_v57  ;;  %v218_v22 = vmul.f32 %v2408_v24, %v2415_v27  ;;  %v2715_v51 = vpop.permute.xlu1 %532 }
  0xa4   :  { %2078 = vmatprep.subr.bf16.mxu1 %v2077_v58  ;;  %v2075_v1 = vpack.c.bf16 %v517_v39, %v501_v56  ;;  %v487_v60 = vadd.f32 %v2481_v47, %v445_v21  ;;  %v234_v61 = vmul.f32 %v2408_v24, %v2451_v59  ;;  %v402_v2 = vmul.f32 %v2411_v25, %v2413_v26 }
  0xa5   :  { %2025 = vmatmul.mubr.msk.f32.vlgmr.msra.gmra.mrb[8].mxu0 %vm545_vm0, %v2506_v32  ;;  %v503_v3 = vmax.f32 %v471_v0, 0.0  ;;  %v432_v4 = vadd.f32 %v400_v43, %v216_v38  ;;  %v448_v12 = vadd.f32 %v416_v10, %v232_v20  ;;  %v418_v23 = vmul.f32 %v2411_v25, %v2449_v57 }
  0xa6   :  { %2029 = vmatmul.mubr.msk.f32.vlgmr.msra.gmra.mrb[8].mxu1 %vm545_vm0, %v2506_v32  ;;  %2076 = vmatpush1.bf16.msra.mxu0 %v2075_v1  ;;  %v519_v5 = vmax.f32 %v487_v60, 0.0  ;;  %v434_v6 = vadd.f32 %v402_v2, %v218_v22  ;;  %v215_v24 = vmul.f32 %v2418_v28, %v2415_v27  ;;  %v231_v36 = vmul.f32 %v2418_v28, %v2451_v59 }
  0xa7   :  { %v474_v7 = vadd.f32 %v2477_v8, %v432_v4  ;;  %v490_v40 = vadd.f32 %v2481_v47, %v448_v12  ;;  %v450_v42 = vadd.f32 %v418_v23, %v234_v61  ;;  %806 = vmatprep.mubr.f32.mxu0 %v2187_v11  ;;  %895 = vmatprep.mubr.f32.mxu1 %v2187_v11 }
  0xa8   :  { %v2079_v25 = vpack.c.bf16 %v519_v5, %v503_v3  ;;  %v476_v41 = vadd.f32 %v2477_v8, %v434_v6  ;;  %v399_v15 = vmul.f32 %v2421_v29, %v2413_v26  ;;  %v415_v52 = vmul.f32 %v2421_v29, %v2449_v57 }
  0xa9   :  { %v506_v62 = vmax.f32 %v474_v7, 0.0  ;;  %v522_v28 = vmax.f32 %v490_v40, 0.0  ;;  %v492_v63 = vadd.f32 %v2481_v47, %v450_v42  ;;  %2026 = vmatmul.mubr.msk.f32.gmra.mrb[10].mxu0 %vm545_vm0, %v2531_v44  ;;  %v217_v45 = vmul.f32 %v2424_v30, %v2415_v27  ;;  %v2725_v42 = vpop.permute.xlu0 %537 }
  0xaa   :  { %2080 = vmatpush1.bf16.msra.mxu1 %v2079_v25  ;;  %v508_v9 = vmax.f32 %v476_v41, 0.0  ;;  %812 = vmatprep.mubr.f32.mxu0 %v2187_v11  ;;  %v431_v46 = vadd.f32 %v399_v15, %v215_v24  ;;  %v447_v48 = vadd.f32 %v415_v52, %v231_v36  ;;  %v233_v17 = vmul.f32 %v2424_v30, %v2451_v59  ;;  %v2728_v52 = vpop.permute.xlu1 %542 }
  0xab   :  { %v2081_v29 = vpack.c.bf16 %v522_v28, %v506_v62  ;;  %v524_v53 = vmax.f32 %v492_v63, 0.0  ;;  %2030 = vmatmul.mubr.msk.f32.gmra.mrb[10].mxu1 %vm545_vm0, %v2531_v44  ;;  %v401_v33 = vmul.f32 %v2427_v31, %v2413_v26  ;;  %v417_v27 = vmul.f32 %v2427_v31, %v2449_v57 }
  0xac   :  { %901 = vmatprep.mubr.f32.mxu1 %v2187_v11  ;;  %v473_v34 = vadd.f32 %v2477_v8, %v431_v46  ;;  %v489_v49 = vadd.f32 %v2481_v47, %v447_v48 }
  0xad   :  { %2082 = vmatprep.subr.bf16.mxu0 %v2081_v29  ;;  %v2085_v50 = vpack.c.bf16 %v524_v53, %v508_v9  ;;  %2027 = vmatmul.mubr.msk.f32.gmra.mrb[12].mxu0 %vm545_vm0, %v2558_v14  ;;  %v433_v30 = vadd.f32 %v401_v33, %v217_v45  ;;  %v449_v59 = vadd.f32 %v417_v27, %v233_v17 }
  0xae   :  { %818 = vmatprep.mubr.f32.mxu0 %v2187_v11  ;;  %v505_v57 = vmax.f32 %v473_v34, 0.0  ;;  %v521_v35 = vmax.f32 %v489_v49, 0.0 }
  0xaf   :  { %2086 = vmatprep.subr.bf16.mxu1 %v2085_v50  ;;  %2031 = vmatmul.mubr.msk.f32.gmra.mrb[12].mxu1 %vm545_vm0, %v2558_v14  ;;  %v475_v26 = vadd.f32 %v2477_v8, %v433_v30  ;;  %v491_v31 = vadd.f32 %v2481_v47, %v449_v59 }
  0xb0   :  { %907 = vmatprep.mubr.f32.mxu1 %v2187_v11  ;;  %v2083_v16 = vpack.c.bf16 %v521_v35, %v505_v57 }
  0xb1   :  { %2028 = vmatmul.mubr.msk.f32.gmra.mrb[14].mxu0 %vm545_vm0, %v2582_v18  ;;  %v507_v37 = vmax.f32 %v475_v26, 0.0  ;;  %v523_v54 = vmax.f32 %v491_v31, 0.0 }
  0xb2   :  { %978 = vmatprep.mubr.f32.mxu0 %v2187_v11 }
  0xb3   :  { %2032 = vmatmul.mubr.msk.f32.gmra.mrb[14].mxu1 %vm545_vm0, %v2582_v18  ;;  %v2087_v8 = vpack.c.bf16 %v523_v54, %v507_v37 }
  0xb4   :  { %1067 = vmatprep.mubr.f32.mxu1 %v2187_v11 }
  0xb5   :  { %2033 = vmatmul.mubr.msk.f32.vlgmr.msra.gmra.mrb[16].mxu0 %vm545_vm0, %v2506_v32 }
  0xb6   :  { %2084 = vmatpush1.bf16.msra.mxu0 %v2083_v16  ;;  %984 = vmatprep.mubr.f32.mxu0 %v2187_v11 }
  0xb7   :  { %2037 = vmatmul.mubr.msk.f32.vlgmr.msra.gmra.mrb[16].mxu1 %vm545_vm0, %v2506_v32 }
  0xb8   :  { %2088 = vmatpush1.bf16.msra.mxu1 %v2087_v8  ;;  %1073 = vmatprep.mubr.f32.mxu1 %v2187_v11 }
  0xb9   :  { %2034 = vmatmul.mubr.msk.f32.gmra.mrb[18].mxu0 %vm545_vm0, %v2531_v44 }
  0xba   :  { %990 = vmatprep.mubr.f32.mxu0 %v2187_v11 }
  0xbb   :  { %2038 = vmatmul.mubr.msk.f32.gmra.mrb[18].mxu1 %vm545_vm0, %v2531_v44 }
  0xbc   :  { %1079 = vmatprep.mubr.f32.mxu1 %v2187_v11 }
  0xbd   :  { %2035 = vmatmul.mubr.msk.f32.gmra.mrb[20].mxu0 %vm545_vm0, %v2558_v14 }
  0xbe   :  { %996 = vmatprep.mubr.f32.mxu0 %v2187_v11 }
  0xbf   :  { %2039 = vmatmul.mubr.msk.f32.gmra.mrb[20].mxu1 %vm545_vm0, %v2558_v14 }
  0xc0   :  { %1085 = vmatprep.mubr.f32.mxu1 %v2187_v11 }
  0xc1   :  { %2036 = vmatmul.mubr.msk.f32.gmra.mrb[22].mxu0 %vm545_vm0, %v2582_v18 }
  0xc2   :  { %1156 = vmatprep.mubr.f32.mxu0 %v2187_v11 }
  0xc3   :  { %2040 = vmatmul.mubr.msk.f32.gmra.mrb[22].mxu1 %vm545_vm0, %v2582_v18 }
  0xc4   :  { %1245 = vmatprep.mubr.f32.mxu1 %v2187_v11 }
  0xc5   :  { %2041 = vmatmul.mubr.msk.f32.vlgmr.msra.gmra.mrb[24].mxu0 %vm545_vm0, %v2506_v32 }
  0xc6   :  { %1162 = vmatprep.mubr.f32.mxu0 %v2187_v11 }
  0xc7   :  { %2045 = vmatmul.mubr.msk.f32.vlgmr.msra.gmra.mrb[24].mxu1 %vm545_vm0, %v2506_v32 }
  0xc8   :  { %1251 = vmatprep.mubr.f32.mxu1 %v2187_v11 }
  0xc9   :  { %2042 = vmatmul.mubr.msk.f32.gmra.mrb[26].mxu0 %vm545_vm0, %v2531_v44 }
  0xca   :  { %1168 = vmatprep.mubr.f32.mxu0 %v2187_v11 }
  0xcb   :  { %2046 = vmatmul.mubr.msk.f32.gmra.mrb[26].mxu1 %vm545_vm0, %v2531_v44 }
  0xcc   :  { %1257 = vmatprep.mubr.f32.mxu1 %v2187_v11 }
  0xcd   :  { %2043 = vmatmul.mubr.msk.f32.gmra.mrb[28].mxu0 %vm545_vm0, %v2558_v14 }
  0xce   :  { %1174 = vmatprep.mubr.f32.mxu0 %v2187_v11 }
  0xcf   :  { %2047 = vmatmul.mubr.msk.f32.gmra.mrb[28].mxu1 %vm545_vm0, %v2558_v14 }
  0xd0   :  { %1263 = vmatprep.mubr.f32.mxu1 %v2187_v11 }
  0xd1   :  { %2044 = vmatmul.mubr.msk.f32.gmra.mrb[30].mxu0 %vm545_vm0, %v2582_v18 }
  0xd2   :  { %1407 = vmatprep.mubr.f32.mxu0 %v2187_v11 }
  0xd3   :  { %2048 = vmatmul.mubr.msk.f32.gmra.mrb[30].mxu1 %vm545_vm0, %v2582_v18 }
  0xd4   :  { %1478 = vmatprep.mubr.f32.mxu1 %v2187_v11 }
 0x168   :  { %v624_v47 = vpop.f32.mrb[0].mxu0  ;;  %v713_v32 = vpop.f32.mrb[0].mxu1 }
 0x169   :  { %v626_v44 = vpop.f32.mrb[1].mxu0  ;;  %v715_v55 = vpop.f32.mrb[1].mxu1  ;;  %v625_v14 = vadd.f32 %v624_v47, %v2713_v19  ;;  %v714_v38 = vadd.f32 %v713_v32, %v2713_v19 }
 0x16a   :  { %v627_v20 = vadd.f32 %v626_v44, %v2713_v19  ;;  %v716_v58 = vadd.f32 %v715_v55, %v2713_v19 }
 0x16b   :  { %v1270_v1 = vmax.f32 %v625_v14, 0.0  ;;  %v1272_v60 = vmax.f32 %v714_v38, 0.0 }
 0x16c   :  { %v630_v56 = vpop.f32.mrb[2].mxu0  ;;  %v719_v18 = vpop.f32.mrb[2].mxu1  ;;  %v1271_v3 = vmax.f32 %v627_v20, 0.0  ;;  %v1273_v4 = vmax.f32 %v716_v58, 0.0 }
 0x16d   :  { %v631_v39 = vadd.f32 %v630_v56, %v2715_v51  ;;  %v720_v21 = vadd.f32 %v719_v18, %v2715_v51  ;;  %v632_v0 = vpop.f32.mrb[3].mxu0  ;;  %v721_v43 = vpop.f32.mrb[3].mxu1  ;;  %v2744_v56 = vld [vmem:[%s2830_s5] sm:$0x3] }
 0x16e   :  { %v633_v10 = vadd.f32 %v632_v0, %v2715_v51  ;;  %v722_v22 = vadd.f32 %v721_v43, %v2715_v51 }
 0x16f   :  { %v1286_v61 = vmax.f32 %v631_v39, 0.0  ;;  %v1288_v2 = vmax.f32 %v720_v21, 0.0 }
 0x170   :  { %v1287_v12 = vmax.f32 %v633_v10, 0.0  ;;  %v1289_v23 = vmax.f32 %v722_v22, 0.0  ;;  %v636_v5 = vpop.f32.mrb[4].mxu0  ;;  %v725_v6 = vpop.f32.mrb[4].mxu1 }
 0x171   :  { %v2091_v24 = vpack.c.bf16 %v1286_v61, %v1270_v1  ;;  %v2099_v36 = vpack.c.bf16 %v1288_v2, %v1272_v60  ;;  %v638_v7 = vpop.f32.mrb[5].mxu0  ;;  %v727_v40 = vpop.f32.mrb[5].mxu1  ;;  %v637_v15 = vadd.f32 %v636_v5, %v2725_v42  ;;  %v726_v62 = vadd.f32 %v725_v6, %v2725_v42 }
 0x172   :  { %v2089_v25 = vpack.c.bf16 %v1287_v12, %v1271_v3  ;;  %v2097_v41 = vpack.c.bf16 %v1289_v23, %v1273_v4  ;;  %v639_v28 = vadd.f32 %v638_v7, %v2725_v42  ;;  %v728_v45 = vadd.f32 %v727_v40, %v2725_v42 }
 0x173   :  { %v1302_v33 = vmax.f32 %v637_v15, 0.0  ;;  %v1304_v49 = vmax.f32 %v726_v62, 0.0 }
 0x174   :  { %v642_v63 = vpop.f32.mrb[6].mxu0  ;;  %2090 = vmatprep.subr.bf16.mxu0 %v2089_v25  ;;  %2098 = vmatprep.subr.bf16.mxu1 %v2097_v41  ;;  %v1303_v50 = vmax.f32 %v639_v28, 0.0  ;;  %v1305_v31 = vmax.f32 %v728_v45, 0.0 }
 0x175   :  { %v643_v9 = vadd.f32 %v642_v63, %v2728_v52  ;;  %v731_v46 = vpop.f32.mrb[6].mxu1  ;;  %v644_v48 = vpop.f32.mrb[7].mxu0  ;;  %2092 = vmatpush1.bf16.msra.mxu0 %v2091_v24  ;;  %2100 = vmatpush1.bf16.msra.mxu1 %v2099_v36 }
 0x176   :  { %v732_v17 = vadd.f32 %v731_v46, %v2728_v52  ;;  %v645_v29 = vadd.f32 %v644_v48, %v2728_v52  ;;  %v733_v53 = vpop.f32.mrb[7].mxu1 }
 0x177   :  { %v1318_v27 = vmax.f32 %v643_v9, 0.0  ;;  %v734_v34 = vadd.f32 %v733_v53, %v2728_v52 }
 0x178   :  { %v1320_v30 = vmax.f32 %v732_v17, 0.0  ;;  %v1319_v59 = vmax.f32 %v645_v29, 0.0  ;;  %v802_v26 = vpop.f32.mrb[8].mxu0 }
 0x179   :  { %v2095_v57 = vpack.c.bf16 %v1318_v27, %v1302_v33  ;;  %v1321_v35 = vmax.f32 %v734_v34, 0.0  ;;  %v891_v37 = vpop.f32.mrb[8].mxu1  ;;  %v804_v54 = vpop.f32.mrb[9].mxu0  ;;  %v803_v44 = vadd.f32 %v802_v26, %v2713_v19 }
 0x17a   :  { %v2103_v16 = vpack.c.bf16 %v1320_v30, %v1304_v49  ;;  %v2093_v8 = vpack.c.bf16 %v1319_v59, %v1303_v50  ;;  %v893_v47 = vpop.f32.mrb[9].mxu1  ;;  %v805_v55 = vadd.f32 %v804_v54, %v2713_v19  ;;  %v892_v38 = vadd.f32 %v891_v37, %v2713_v19 }
 0x17b   :  { %v2101_v32 = vpack.c.bf16 %v1321_v35, %v1305_v31  ;;  %v894_v18 = vadd.f32 %v893_v47, %v2713_v19  ;;  %v1274_v0 = vmax.f32 %v803_v44, 0.0 }
 0x17c   :  { %v808_v14 = vpop.f32.mrb[10].mxu0  ;;  %2094 = vmatprep.subr.bf16.mxu0 %v2093_v8  ;;  %v1275_v1 = vmax.f32 %v805_v55, 0.0  ;;  %v1276_v3 = vmax.f32 %v892_v38, 0.0 }
 0x17d   :  { %v809_v20 = vadd.f32 %v808_v14, %v2715_v51  ;;  %2102 = vmatprep.subr.bf16.mxu1 %v2101_v32  ;;  %v810_v58 = vpop.f32.mrb[11].mxu0  ;;  %2096 = vmatpush1.bf16.msra.mxu0 %v2095_v57  ;;  %v1277_v5 = vmax.f32 %v894_v18, 0.0 }
 0x17e   :  { %v897_v39 = vpop.f32.mrb[10].mxu1  ;;  %v811_v21 = vadd.f32 %v810_v58, %v2715_v51  ;;  %2104 = vmatpush1.bf16.msra.mxu1 %v2103_v16 }
 0x17f   :  { %v1290_v43 = vmax.f32 %v809_v20, 0.0  ;;  %v898_v10 = vadd.f32 %v897_v39, %v2715_v51  ;;  %v899_v22 = vpop.f32.mrb[11].mxu1 }
 0x180   :  { %v1291_v60 = vmax.f32 %v811_v21, 0.0  ;;  %v900_v61 = vadd.f32 %v899_v22, %v2715_v51  ;;  %v814_v2 = vpop.f32.mrb[12].mxu0  ;;  %2049 = vmatmul.mubr.msk.f32.vlgmr.msra.gmra.mrb[32].mxu0 %vm1339_vm1, %v2744_v56 }
 0x181   :  { %v2107_v4 = vpack.c.bf16 %v1290_v43, %v1274_v0  ;;  %v1292_v12 = vmax.f32 %v898_v10, 0.0  ;;  %2050 = vmatmul.mubr.msk.f32.vlgmr.msra.gmra.mrb[32].mxu1 %vm1339_vm1, %v2744_v56  ;;  %v816_v23 = vpop.f32.mrb[13].mxu0  ;;  %1549 = vmatprep.mubr.f32.mxu0 %v2187_v11  ;;  %v815_v40 = vadd.f32 %v814_v2, %v2725_v42 }
 0x182   :  { %v2105_v6 = vpack.c.bf16 %v1291_v60, %v1275_v1  ;;  %v1293_v24 = vmax.f32 %v900_v61, 0.0  ;;  %v903_v36 = vpop.f32.mrb[12].mxu1  ;;  %1620 = vmatprep.mubr.f32.mxu1 %v2187_v11  ;;  %v817_v15 = vadd.f32 %v816_v23, %v2725_v42 }
 0x183   :  { %v2115_v7 = vpack.c.bf16 %v1292_v12, %v1276_v3  ;;  %v905_v25 = vpop.f32.mrb[13].mxu1  ;;  %v904_v28 = vadd.f32 %v903_v36, %v2725_v42  ;;  %v1306_v17 = vmax.f32 %v815_v40, 0.0 }
 0x184   :  { %v2113_v41 = vpack.c.bf16 %v1293_v24, %v1277_v5  ;;  %v820_v62 = vpop.f32.mrb[14].mxu0  ;;  %2106 = vmatprep.subr.bf16.mxu0 %v2105_v6  ;;  %v906_v9 = vadd.f32 %v905_v25, %v2725_v42  ;;  %v1307_v27 = vmax.f32 %v817_v15, 0.0 }
 0x185   :  { %v821_v63 = vadd.f32 %v820_v62, %v2728_v52  ;;  %v822_v45 = vpop.f32.mrb[15].mxu0  ;;  %2108 = vmatpush1.bf16.msra.mxu0 %v2107_v4  ;;  %v1308_v30 = vmax.f32 %v904_v28, 0.0 }
 0x186   :  { %v909_v46 = vpop.f32.mrb[14].mxu1  ;;  %2114 = vmatprep.subr.bf16.mxu1 %v2113_v41  ;;  %v823_v48 = vadd.f32 %v822_v45, %v2728_v52  ;;  %v1309_v57 = vmax.f32 %v906_v9, 0.0 }
 0x187   :  { %v1322_v29 = vmax.f32 %v821_v63, 0.0  ;;  %v910_v53 = vadd.f32 %v909_v46, %v2728_v52  ;;  %v911_v33 = vpop.f32.mrb[15].mxu1  ;;  %2116 = vmatpush1.bf16.msra.mxu1 %v2115_v7 }
 0x188   :  { %v1323_v34 = vmax.f32 %v823_v48, 0.0  ;;  %v912_v49 = vadd.f32 %v911_v33, %v2728_v52  ;;  %v980_v50 = vpop.f32.mrb[16].mxu0 }
 0x189   :  { %v2111_v59 = vpack.c.bf16 %v1322_v29, %v1306_v17  ;;  %v1324_v26 = vmax.f32 %v910_v53, 0.0  ;;  %v982_v31 = vpop.f32.mrb[17].mxu0  ;;  %v981_v8 = vadd.f32 %v980_v50, %v2713_v19 }
 0x18a   :  { %v2109_v35 = vpack.c.bf16 %v1323_v34, %v1307_v27  ;;  %v1325_v37 = vmax.f32 %v912_v49, 0.0  ;;  %v1069_v54 = vpop.f32.mrb[16].mxu1  ;;  %v983_v44 = vadd.f32 %v982_v31, %v2713_v19 }
 0x18b   :  { %v2119_v16 = vpack.c.bf16 %v1324_v26, %v1308_v30  ;;  %v1071_v47 = vpop.f32.mrb[17].mxu1  ;;  %v1070_v14 = vadd.f32 %v1069_v54, %v2713_v19  ;;  %v1278_v21 = vmax.f32 %v981_v8, 0.0 }
 0x18c   :  { %v2117_v32 = vpack.c.bf16 %v1325_v37, %v1309_v57  ;;  %v986_v55 = vpop.f32.mrb[18].mxu0  ;;  %2110 = vmatprep.subr.bf16.mxu0 %v2109_v35  ;;  %v1072_v58 = vadd.f32 %v1071_v47, %v2713_v19  ;;  %v1279_v22 = vmax.f32 %v983_v44, 0.0 }
 0x18d   :  { %v987_v38 = vadd.f32 %v986_v55, %v2715_v51  ;;  %v988_v20 = vpop.f32.mrb[19].mxu0  ;;  %2112 = vmatpush1.bf16.msra.mxu0 %v2111_v59  ;;  %v1280_v2 = vmax.f32 %v1070_v14, 0.0 }
 0x18e   :  { %v1075_v18 = vpop.f32.mrb[18].mxu1  ;;  %2118 = vmatprep.subr.bf16.mxu1 %v2117_v32  ;;  %v989_v39 = vadd.f32 %v988_v20, %v2715_v51  ;;  %v1281_v23 = vmax.f32 %v1072_v58, 0.0 }
 0x18f   :  { %v1294_v0 = vmax.f32 %v987_v38, 0.0  ;;  %v1076_v43 = vadd.f32 %v1075_v18, %v2715_v51  ;;  %v1077_v10 = vpop.f32.mrb[19].mxu1  ;;  %2120 = vmatpush1.bf16.msra.mxu1 %v2119_v16 }
 0x190   :  { %v1295_v1 = vmax.f32 %v989_v39, 0.0  ;;  %v1078_v60 = vadd.f32 %v1077_v10, %v2715_v51  ;;  %v992_v61 = vpop.f32.mrb[20].mxu0  ;;  %2051 = vmatmul.mubr.msk.f32.vlgmr.msra.gmra.mrb[34].mxu0 %vm1339_vm1, %v2744_v56 }
 0x191   :  { %v2123_v3 = vpack.c.bf16 %v1294_v0, %v1278_v21  ;;  %v1296_v4 = vmax.f32 %v1076_v43, 0.0  ;;  %v994_v12 = vpop.f32.mrb[21].mxu0  ;;  %1691 = vmatprep.mubr.f32.mxu0 %v2187_v11  ;;  %v993_v7 = vadd.f32 %v992_v61, %v2725_v42 }
 0x192   :  { %v2121_v5 = vpack.c.bf16 %v1295_v1, %v1279_v22  ;;  %v1297_v6 = vmax.f32 %v1078_v60, 0.0  ;;  %v1081_v24 = vpop.f32.mrb[20].mxu1  ;;  %2052 = vmatmul.mubr.msk.f32.vlgmr.msra.gmra.mrb[34].mxu1 %vm1339_vm1, %v2744_v56  ;;  %v995_v41 = vadd.f32 %v994_v12, %v2725_v42 }
 0x193   :  { %v2131_v36 = vpack.c.bf16 %v1296_v4, %v1280_v2  ;;  %v1083_v40 = vpop.f32.mrb[21].mxu1  ;;  %1762 = vmatprep.mubr.f32.mxu1 %v2187_v11  ;;  %v1082_v62 = vadd.f32 %v1081_v24, %v2725_v42  ;;  %v1310_v48 = vmax.f32 %v993_v7, 0.0 }
 0x194   :  { %v2129_v25 = vpack.c.bf16 %v1297_v6, %v1281_v23  ;;  %v998_v15 = vpop.f32.mrb[22].mxu0  ;;  %2122 = vmatprep.subr.bf16.mxu0 %v2121_v5  ;;  %v1084_v45 = vadd.f32 %v1083_v40, %v2725_v42  ;;  %v1311_v33 = vmax.f32 %v995_v41, 0.0 }
 0x195   :  { %v999_v28 = vadd.f32 %v998_v15, %v2728_v52  ;;  %v1000_v63 = vpop.f32.mrb[23].mxu0  ;;  %2124 = vmatpush1.bf16.msra.mxu0 %v2123_v3  ;;  %v1312_v50 = vmax.f32 %v1082_v62, 0.0 }
 0x196   :  { %v1087_v9 = vpop.f32.mrb[22].mxu1  ;;  %2130 = vmatprep.subr.bf16.mxu1 %v2129_v25  ;;  %v1001_v46 = vadd.f32 %v1000_v63, %v2728_v52  ;;  %v1313_v31 = vmax.f32 %v1084_v45, 0.0 }
 0x197   :  { %v1326_v17 = vmax.f32 %v999_v28, 0.0  ;;  %v1088_v29 = vadd.f32 %v1087_v9, %v2728_v52  ;;  %v1089_v53 = vpop.f32.mrb[23].mxu1  ;;  %2132 = vmatpush1.bf16.msra.mxu1 %v2131_v36 }
 0x198   :  { %v1327_v27 = vmax.f32 %v1001_v46, 0.0  ;;  %v1090_v34 = vadd.f32 %v1089_v53, %v2728_v52  ;;  %v1158_v49 = vpop.f32.mrb[24].mxu0 }
 0x199   :  { %v2127_v30 = vpack.c.bf16 %v1326_v17, %v1310_v48  ;;  %v1328_v59 = vmax.f32 %v1088_v29, 0.0  ;;  %v1160_v26 = vpop.f32.mrb[25].mxu0  ;;  %v1159_v16 = vadd.f32 %v1158_v49, %v2713_v19 }
 0x19a   :  { %v2125_v57 = vpack.c.bf16 %v1327_v27, %v1311_v33  ;;  %v1329_v35 = vmax.f32 %v1090_v34, 0.0  ;;  %v1247_v37 = vpop.f32.mrb[24].mxu1  ;;  %v1161_v32 = vadd.f32 %v1160_v26, %v2713_v19 }
 0x19b   :  { %v2135_v54 = vpack.c.bf16 %v1328_v59, %v1312_v50  ;;  %v1249_v8 = vpop.f32.mrb[25].mxu1  ;;  %v1248_v55 = vadd.f32 %v1247_v37, %v2713_v19  ;;  %v1282_v39 = vmax.f32 %v1159_v16, 0.0  ;;  %v2188_v59 = vmov 1983009808  }
 0x19c   :  { %v2133_v47 = vpack.c.bf16 %v1329_v35, %v1313_v31  ;;  %v1164_v44 = vpop.f32.mrb[26].mxu0  ;;  %2126 = vmatprep.subr.bf16.mxu0 %v2125_v57  ;;  %v1250_v20 = vadd.f32 %v1249_v8, %v2713_v19  ;;  %v1283_v10 = vmax.f32 %v1161_v32, 0.0  ;;  %v1337_v31 = vpop.permute.xlu0 %1336 }
 0x19d   :  { %v1165_v14 = vadd.f32 %v1164_v44, %v2715_v51  ;;  %v1166_v38 = vpop.f32.mrb[27].mxu0  ;;  %2128 = vmatpush1.bf16.msra.mxu0 %v2127_v30  ;;  %v1284_v61 = vmax.f32 %v1248_v55, 0.0 }
 0x19e   :  { %v1253_v58 = vpop.f32.mrb[26].mxu1  ;;  %2134 = vmatprep.subr.bf16.mxu1 %v2133_v47  ;;  %v1167_v18 = vadd.f32 %v1166_v38, %v2715_v51  ;;  %v1285_v4 = vmax.f32 %v1250_v20, 0.0 }
 0x19f   :  { %v1298_v21 = vmax.f32 %v1165_v14, 0.0  ;;  %v1254_v0 = vadd.f32 %v1253_v58, %v2715_v51  ;;  %v1255_v43 = vpop.f32.mrb[27].mxu1  ;;  %2136 = vmatpush1.bf16.msra.mxu1 %v2135_v54 }
 0x1a0   :  { %v1299_v22 = vmax.f32 %v1167_v18, 0.0  ;;  %v1256_v1 = vadd.f32 %v1255_v43, %v2715_v51  ;;  %v1170_v60 = vpop.f32.mrb[28].mxu0  ;;  %2053 = vmatmul.mubr.msk.f32.vlgmr.msra.gmra.mrb[36].mxu0 %vm1339_vm1, %v2744_v56 }
 0x1a1   :  { %v2139_v19 = vpack.c.bf16 %v1298_v21, %v1282_v39  ;;  %v1300_v2 = vmax.f32 %v1254_v0, 0.0  ;;  %v1172_v3 = vpop.f32.mrb[29].mxu0  ;;  %1833 = vmatprep.mubr.f32.mxu0 %v2187_v11  ;;  %v1171_v51 = vadd.f32 %v1170_v60, %v2725_v42 }
 0x1a2   :  { %v2137_v12 = vpack.c.bf16 %v1299_v22, %v1283_v10  ;;  %v1301_v23 = vmax.f32 %v1256_v1, 0.0  ;;  %v1259_v5 = vpop.f32.mrb[28].mxu1  ;;  %2054 = vmatmul.mubr.msk.f32.vlgmr.msra.gmra.mrb[36].mxu1 %vm1339_vm1, %v2744_v56  ;;  %v1173_v7 = vadd.f32 %v1172_v3, %v2725_v42 }
 0x1a3   :  { %v2147_v6 = vpack.c.bf16 %v1300_v2, %v1284_v61  ;;  %v1261_v24 = vpop.f32.mrb[29].mxu1  ;;  %1904 = vmatprep.mubr.f32.mxu1 %v2187_v11  ;;  %v1260_v25 = vadd.f32 %v1259_v5, %v2725_v42  ;;  %v1314_v45 = vmax.f32 %v1171_v51, 0.0 }
 0x1a4   :  { %v2145_v36 = vpack.c.bf16 %v1301_v23, %v1285_v4  ;;  %v1176_v40 = vpop.f32.mrb[30].mxu0  ;;  %2138 = vmatprep.subr.bf16.mxu0 %v2137_v12  ;;  %v1262_v62 = vadd.f32 %v1261_v24, %v2725_v42  ;;  %v1315_v48 = vmax.f32 %v1173_v7, 0.0 }
 0x1a5   :  { %v1177_v41 = vadd.f32 %v1176_v40, %v2728_v52  ;;  %v1178_v15 = vpop.f32.mrb[31].mxu0  ;;  %2140 = vmatpush1.bf16.msra.mxu0 %v2139_v19  ;;  %v1316_v53 = vmax.f32 %v1260_v25, 0.0 }
 0x1a6   :  { %v1265_v28 = vpop.f32.mrb[30].mxu1  ;;  %2146 = vmatprep.subr.bf16.mxu1 %v2145_v36  ;;  %v1179_v63 = vadd.f32 %v1178_v15, %v2728_v52  ;;  %v1317_v34 = vmax.f32 %v1262_v62, 0.0 }
 0x1a7   :  { %v1330_v9 = vmax.f32 %v1177_v41, 0.0  ;;  %v1266_v11 = vadd.f32 %v1265_v28, %v2728_v52  ;;  %v1267_v46 = vpop.f32.mrb[31].mxu1  ;;  %2148 = vmatpush1.bf16.msra.mxu1 %v2147_v6 }
 0x1a8   :  { %v1331_v17 = vmax.f32 %v1179_v63, 0.0  ;;  %v1268_v29 = vadd.f32 %v1267_v46, %v2728_v52  ;;  %v1930_v52 = vunpack.c.l.s4 %v2188_v59 }
 0x1a9   :  { %v2143_v33 = vpack.c.bf16 %v1330_v9, %v1314_v45  ;;  %v1332_v27 = vmax.f32 %v1266_v11, 0.0 }
 0x1aa   :  { %v2141_v49 = vpack.c.bf16 %v1331_v17, %v1315_v48  ;;  %v1333_v42 = vmax.f32 %v1268_v29, 0.0  ;;  %v1931_v26 = vunpack.c.0.s8 %v1930_v52 }
 0x1ab   :  { %v2151_v50 = vpack.c.bf16 %v1332_v27, %v1316_v53 }
 0x1ac   :  { %v2149_v30 = vpack.c.bf16 %v1333_v42, %v1317_v34  ;;  %2142 = vmatprep.subr.bf16.mxu0 %v2141_v49  ;;  %v1934_v47 = vsub.s32 %v1931_v26, %v2259_v13 }
 0x1ad   :  { %2144 = vmatpush1.bf16.msra.mxu0 %v2143_v33 }
 0x1ae   :  { %2150 = vmatprep.subr.bf16.mxu1 %v2149_v30 }
 0x1af   :  { %2152 = vmatpush1.bf16.msra.mxu1 %v2151_v50 }
 0x1b0   :  { %2055 = vmatmul.mubr.msk.f32.vlgmr.msra.gmra.mrb[38].mxu0 %vm1339_vm1, %v2744_v56 }
 0x1b2   :  { %2056 = vmatmul.mubr.msk.f32.vlgmr.msra.gmra.mrb[38].mxu1 %vm1339_vm1, %v2744_v56 }
 0x253   :  { %v1409_v57 = vpop.f32.mrb[32].mxu0 }
 0x254   :  { %v1410_v35 = vadd.f32 %v1409_v57, %v1337_v31  ;;  %v1480_v37 = vpop.f32.mrb[32].mxu1  ;;  %v1411_v54 = vpop.f32.mrb[33].mxu0 }
 0x255   :  { %v1481_v16 = vadd.f32 %v1480_v37, %v1337_v31  ;;  %v1412_v8 = vadd.f32 %v1411_v54, %v1337_v31  ;;  %v1482_v32 = vpop.f32.mrb[33].mxu1 }
 0x256   :  { %v1483_v44 = vadd.f32 %v1482_v32, %v1337_v31 }
 0x257   :  { %v1927_v55 = vcombine.low %v1410_v35, %v1412_v8 }
 0x258   :  { %v1928_v14 = vcombine.low %v1481_v16, %v1483_v44 }
 0x259   :  { %v1935_v38 = vrot.slane %v1927_v55, %v1934_v47 }
 0x25a   :  { %v1942_v20 = vrot.slane %v1928_v14, %v1934_v47 }
 0x25c   :  { %v1943_v58 = vcombine.low %v1935_v38, %v1942_v20 }
 0x25e   :  { %1999 = vst [vmem:[#allocation2] sm:$0xff] %v1943_v58 }
 0x263   :  { %v1551_v56 = vpop.f32.mrb[34].mxu0 }
 0x264   :  { %v1552_v18 = vadd.f32 %v1551_v56, %v1337_v31  ;;  %v1553_v39 = vpop.f32.mrb[35].mxu0 }
 0x265   :  { %v1622_v21 = vpop.f32.mrb[34].mxu1  ;;  %v1554_v0 = vadd.f32 %v1553_v39, %v1337_v31 }
 0x266   :  { %v1623_v43 = vadd.f32 %v1622_v21, %v1337_v31  ;;  %v1624_v10 = vpop.f32.mrb[35].mxu1 }
 0x267   :  { %v1944_v22 = vcombine.low %v1552_v18, %v1554_v0  ;;  %v1625_v1 = vadd.f32 %v1624_v10, %v1337_v31 }
 0x269   :  { %v1952_v60 = vrot.slane %v1944_v22, %v1934_v47  ;;  %v1945_v61 = vcombine.low %v1623_v43, %v1625_v1 }
 0x26b   :  { %v1959_v13 = vrot.slane %v1945_v61, %v1934_v47 }
 0x26d   :  { %v1960_v19 = vcombine.low %v1952_v60, %v1959_v13 }
 0x26f   :  { %2000 = vst [vmem:[#allocation2 + $0x8] sm:$0xff] %v1960_v19 }
 0x273   :  { %v1693_v2 = vpop.f32.mrb[36].mxu0 }
 0x274   :  { %v1694_v3 = vadd.f32 %v1693_v2, %v1337_v31  ;;  %v1695_v4 = vpop.f32.mrb[37].mxu0 }
 0x275   :  { %v1764_v12 = vpop.f32.mrb[36].mxu1  ;;  %v1696_v23 = vadd.f32 %v1695_v4, %v1337_v31 }
 0x276   :  { %v1765_v5 = vadd.f32 %v1764_v12, %v1337_v31  ;;  %v1766_v6 = vpop.f32.mrb[37].mxu1 }
 0x277   :  { %v1961_v51 = vcombine.low %v1694_v3, %v1696_v23  ;;  %v1767_v24 = vadd.f32 %v1766_v6, %v1337_v31 }
 0x279   :  { %v1969_v36 = vrot.slane %v1961_v51, %v1934_v47  ;;  %v1962_v7 = vcombine.low %v1765_v5, %v1767_v24 }
 0x27b   :  { %v1976_v40 = vrot.slane %v1962_v7, %v1934_v47 }
 0x27d   :  { %v1977_v25 = vcombine.low %v1969_v36, %v1976_v40 }
 0x27f   :  { %2001 = vst [vmem:[#allocation2 + $0x10] sm:$0xff] %v1977_v25 }
 0x283   :  { %v1835_v41 = vpop.f32.mrb[38].mxu0 }
 0x284   :  { %v1836_v15 = vadd.f32 %v1835_v41, %v1337_v31  ;;  %v1837_v62 = vpop.f32.mrb[39].mxu0 }
 0x285   :  { %v1906_v28 = vpop.f32.mrb[38].mxu1  ;;  %v1838_v63 = vadd.f32 %v1837_v62, %v1337_v31 }
 0x286   :  { %v1907_v45 = vadd.f32 %v1906_v28, %v1337_v31  ;;  %v1908_v9 = vpop.f32.mrb[39].mxu1 }
 0x287   :  { %v1978_v11 = vcombine.low %v1836_v15, %v1838_v63  ;;  %v1909_v46 = vadd.f32 %v1908_v9, %v1337_v31 }
 0x289   :  { %v1986_v48 = vrot.slane %v1978_v11, %v1934_v47  ;;  %v1979_v17 = vcombine.low %v1907_v45, %v1909_v46 }
 0x28b   :  { %v1993_v29 = vrot.slane %v1979_v17, %v1934_v47 }
 0x28d   :  { %v1994_v53 = vcombine.low %v1986_v48, %v1993_v29 }
 0x28f   :  { %2002 = vst [vmem:[#allocation2 + $0x18] sm:$0xff] %v1994_v53 }
 0x290   :  { %2007 = vsyncadd [#allocation3], 480  ;;  %s2189_s5 = smov [#allocation2]  }
 0x291   :  { %s2009_s8 = sshll.u32 %s2189_s5, 4  ;;  %s2010_s8 = int_to_ptr.vmem [resolvable:$true] %s2009_s8 }
 0x292   :  { %s2161_s9 = scalar_lea.vmem %s2010_s8, 32  ;;  %s2165_s10 = scalar_lea.vmem %s2010_s8, 512 }
 0x293   :  { %p2162_p0 = scmp.ne.s32.totalorder %s2010_s8, %s2161_s9  ;;  %p2166_p1 = scmp.lt.s32.totalorder %s2010_s8, %s2010_s8 }
 0x294   :  { %p2167_p2 = scmp.lt.s32.totalorder %s2165_s10, %s2161_s9 }
 0x296   :  { %p2168_p3 = por %p2167_p2, %p2166_p1 }
 0x298   :  { %p2169_p4 = pnand %p2168_p3, %p2162_p0 }
 0x29a   :  { %2172 = shalt.err (!%p2169_p4)
}
 0x29b   :  { %s2173_s12 = scalar_lea.hbm %s2832_s7, 32 }
 0x29c   :  { %p2174_p5 = scmp.ne.s32.totalorder %s2832_s7, %s2173_s12  ;;  %p2177_p6 = scmp.lt.u32.totalorder %s2173_s12, %s2832_s7 }
 0x29e   :  { %p2179_p7 = pnand %p2177_p6, %p2174_p5 }
 0x2a0   :  { %2182 = shalt.err (!%p2179_p7)
}
 0x2a1   :  { %2012 = dma.vmem_to_hbm [thread:$0]  %s2010_s8, 32, %s2832_s7, [#allocation3]  }
 0x2a2   :  { %2183 = dma.done.wait [#allocation3], 512  }
 0x2a3   :  { %2184 = vsyncadd [#allocation3], 4294966784 }
 0x2a4   :  { %2016 = vsyncpa [#allocation3], 1 }

</bundles_post_ra>
